<compile_context>
chip_gen: v5e
topology: v5e:2x2
jax: 0.10.0
libtpu: 0.0.40
codegen_flags: <defaults>
</compile_context>

<pallas_src>
import jax
import jax.numpy as jnp
import numpy as np
from jax.experimental import pallas as pl
from jax.experimental.pallas import tpu as pltpu


def _conv3x3_lrelu_kernel(x_ref, w_ref, b_ref, o_ref, xcol_ref):
    """One (batch, row-tile) grid step.

    x_ref   : (1, 3*Cin, P)   dy-replicated input rows, pixel axis (rows x Wp) on lanes
    w_ref   : (Cout, 9*Cin)   conv weights, K ordered (dx, dy, cin)   [VMEM-resident]
    b_ref   : (Cout, 1)       bias                                    [VMEM-resident]
    o_ref   : (1, Cout, P)    "wide" conv output (padded garbage columns still present)
    xcol_ref: (9*Cin, P)      VMEM scratch holding the assembled im2col block
    """
    c3 = x_ref.shape[1]                      # 3 * Cin
    P = x_ref.shape[2]
    x = x_ref[0]                             # (3*Cin, P)

    # Assemble im2col in VMEM: for each dx in {0,1,2}, a copy of x shifted left by dx lanes.
    # The 1-2 tail lanes only ever feed the padded garbage columns (j >= W), which are
    # discarded in the wrapper, so they are simply zero-filled.
    for dx in range(3):
        r0 = dx * c3
        if dx == 0:
            xcol_ref[pl.ds(r0, c3), pl.ds(0, P)] = x
        else:
            xcol_ref[pl.ds(r0, c3), pl.ds(0, P - dx)] = x[:, dx:]
            xcol_ref[pl.ds(r0, c3), pl.ds(P - dx, dx)] = jnp.zeros((c3, dx), x.dtype)

    # Single fused MXU matmul: K = 9*Cin, pixels on lanes.
    acc = jnp.dot(w_ref[...], xcol_ref[...], preferred_element_type=jnp.float32)
    acc = acc + b_ref[...]                        # (Cout, 1) broadcasts along lanes
    acc = jnp.where(acc >= 0, acc, 0.1 * acc)     # LeakyReLU(negative_slope=0.1)
    o_ref[0] = acc.astype(o_ref.dtype)


def _pick_rows_per_tile(H, Wp, Cin, Cout_full, itemsize, budget_bytes):
    """Largest row-tile (divisor of H) whose per-step working set fits the VMEM budget and whose
    lane width (tile_rows * Wp) is a multiple of 128 (or spans the full pixel axis)."""
    def tile_bytes(ti):
        P = ti * Wp
        x_blk = 3 * Cin * P * itemsize
        o_blk = Cout_full * P * 4
        scratch = 9 * Cin * P * itemsize + Cout_full * P * 4   # im2col scratch + f32 acc
        return 2 * (x_blk + o_blk) + scratch                   # x/out are double-buffered

    cands = [ti for ti in range(1, H + 1)
             if H % ti == 0 and (ti == H or (ti * Wp) % 128 == 0)]
    fitting = [ti for ti in cands if tile_bytes(ti) <= budget_bytes]
    return max(fitting) if fitting else min(cands)


def upsample_block(x_nchw, weight_oihw, bias, up_scale, compute_dtype=None):
    """Equivalent of UpsampleBLock.forward.  x_nchw: (N, Cin, H, W)."""
    N, Cin, H, W = x_nchw.shape
    Cout_full = weight_oihw.shape[0]
    r = up_scale
    Cb = Cout_full // (r * r)

    # Padded row width.  Rounding it up to a multiple of 32 unlocks finer 128-aligned row tiles;
    # only do it when the relative lane overhead is small (skipped for tiny test widths).
    Wp = W + 2
    wp32 = ((Wp + 31) // 32) * 32
    if wp32 - Wp <= max(4, Wp // 8):
        Wp = wp32

    # --- glue: zero-pad, build the 3 dy row-shifted views, flatten (rows, Wp) onto lanes. ---
    x_pad = jnp.pad(x_nchw, ((0, 0), (0, 0), (1, 1), (1, Wp - W - 1)))      # (N, Cin, H+2, Wp)
    x3 = jnp.stack([x_pad[:, :, dy:dy + H, :] for dy in range(3)], axis=1)  # (N, 3, Cin, H, Wp)
    x3 = x3.reshape(N, 3 * Cin, H * Wp)                                     # rows = (dy, cin)

    # weights: (Cout, Cin, ky, kx) -> (Cout, kx, ky, Cin) -> (Cout, 9*Cin), K = (dx, dy, cin)
    w_mat = jnp.transpose(weight_oihw, (0, 3, 2, 1)).reshape(Cout_full, 9 * Cin)
    b_col = bias.reshape(Cout_full, 1).astype(jnp.float32)

    if compute_dtype is not None:            # e.g. jnp.bfloat16 on v6e/v7x (looser numerics)
        x3 = x3.astype(compute_dtype)
        w_mat = w_mat.astype(compute_dtype)

    # --- VMEM budgeting (v7x has only 64 MiB total VMEM). ---
    try:
        vmem_cap = int(pltpu.get_tpu_info().vmem_capacity_bytes)
    except Exception:
        vmem_cap = 64 * 1024 * 1024
    vmem_limit = int(min(48 * 1024 * 1024, vmem_cap // 2))

    itemsize = jnp.dtype(x3.dtype).itemsize
    ti = _pick_rows_per_tile(H, Wp, Cin, Cout_full, itemsize, int(vmem_limit * 0.6))
    P = ti * Wp
    n_tiles = H // ti

    conv_wide = pl.pallas_call(
        _conv3x3_lrelu_kernel,
        out_shape=jax.ShapeDtypeStruct((N, Cout_full, H * Wp), x_nchw.dtype),
        grid_spec=pltpu.PrefetchScalarGridSpec(
            num_scalar_prefetch=0,
            grid=(N, n_tiles),
            in_specs=[
                pl.BlockSpec((1, 3 * Cin, P), lambda n, t: (n, 0, t)),
                pl.BlockSpec((Cout_full, 9 * Cin), lambda n, t: (0, 0)),   # VMEM-resident
                pl.BlockSpec((Cout_full, 1), lambda n, t: (0, 0)),         # VMEM-resident
            ],
            out_specs=pl.BlockSpec((1, Cout_full, P), lambda n, t: (n, 0, t)),
            scratch_shapes=[pltpu.VMEM((9 * Cin, P), x3.dtype)],
        ),
        compiler_params=pltpu.CompilerParams(
            dimension_semantics=("parallel", "parallel"),
            vmem_limit_bytes=vmem_limit),
    )(x3, w_mat, b_col)

    # --- glue: strip padded columns + PixelShuffle (pure relayout; slice fuses into transpose).
    # TODO(synk): fusing the pixel-shuffle interleave into the kernel's out_specs would need
    # strided lane stores; it is left to XLA (one relayout pass over the conv output).
    y = conv_wide.reshape(N, Cout_full, H, Wp)[:, :, :, :W]
    y = y.reshape(N, Cb, r, r, H, W)
    y = jnp.transpose(y, (0, 1, 4, 2, 5, 3))
    return y.reshape(N, Cb, H * r, W * r)


def _reference(x_nchw, weight_oihw, bias, up_scale):
    """Pure-JAX reference matching the PyTorch module (NCHW)."""
    conv = jax.lax.conv_general_dilated(
        x_nchw, weight_oihw, window_strides=(1, 1), padding=((1, 1), (1, 1)),
        dimension_numbers=("NCHW", "OIHW", "NCHW"))
    conv = conv + bias.reshape(1, -1, 1, 1)
    N, Cf, H, W = conv.shape
    r = up_scale
    Cb = Cf // (r * r)
    y = conv.reshape(N, Cb, r, r, H, W)
    y = jnp.transpose(y, (0, 1, 4, 2, 5, 3)).reshape(N, Cb, H * r, W * r)
    return jnp.where(y >= 0, y, 0.1 * y)


if __name__ == "__main__":
    in_channels, out_channels, up_scale = 4, 4, 2
    N, H, W = 2, 16, 16
    Cout_full = out_channels * up_scale ** 2

    key = jax.random.PRNGKey(0)
    kw, kb, kx = jax.random.split(key, 3)
    weight = 0.1 * jax.random.normal(kw, (Cout_full, in_channels, 3, 3), jnp.float32)
    bias = 0.1 * jax.random.normal(kb, (Cout_full,), jnp.float32)
    x = jax.random.normal(kx, (N, in_channels, H, W), jnp.float32)

    out = jax.block_until_ready(upsample_block(x, weight, bias, up_scale))
    ref = jax.block_until_ready(_reference(x, weight, bias, up_scale))

    assert out.shape == (N, out_channels, H * up_scale, W * up_scale), out.shape
    np.testing.assert_allclose(np.asarray(out), np.asarray(ref), rtol=1e-4, atol=1e-4)
    print("KERNEL_OK")
</pallas_src>

<mosaic_0001>
module attributes {stable_mosaic.version = 11 : i64} {
  func.func @_conv3x3_lrelu_kernel(%arg0: i32, %arg1: i32, %arg2: memref<1x12x288xf32, #tpu.memory_space<vmem>>, %arg3: memref<16x36xf32, #tpu.memory_space<vmem>>, %arg4: memref<16x1xf32, #tpu.memory_space<vmem>>, %arg5: memref<1x16x288xf32, #tpu.memory_space<vmem>>, %arg6: memref<36x288xf32, #tpu.memory_space<vmem>>) attributes {dimension_semantics = [#tpu.dimension_semantics<parallel>, #tpu.dimension_semantics<parallel>], iteration_bounds = array<i64: 2, 1>, scalar_prefetch = 0 : i64, scratch_operands = 1 : i64, tpu.core_type = #tpu.core_type<tc>, window_params = [{transform_indices = @transform_0, window_bounds = array<i64: 1, 12, 288>}, {pipeline_mode = #tpu.pipeline_mode<synchronous>, transform_indices = @transform_1, window_bounds = array<i64: 16, 36>}, {pipeline_mode = #tpu.pipeline_mode<synchronous>, transform_indices = @transform_2, window_bounds = array<i64: 16, 1>}, {transform_indices = @transform_3, window_bounds = array<i64: 1, 16, 288>}]} {
    %c0 = arith.constant 0 : index
    %c0_0 = arith.constant 0 : index
    %c0_1 = arith.constant 0 : index
    %0 = vector.load %arg2[%c0, %c0_0, %c0_1] : memref<1x12x288xf32, #tpu.memory_space<vmem>>, vector<1x12x288xf32>
    %1 = vector.shape_cast %0 : vector<1x12x288xf32> to vector<12x288xf32>
    %c0_2 = arith.constant 0 : index
    %c0_3 = arith.constant 0 : index
    %2 = vector.load %arg6[%c0_2, %c0_3] : memref<36x288xf32, #tpu.memory_space<vmem>>, vector<12x288xf32>
    tpu.vector_store %arg6[%c0_2, %c0_3], %1 {strides = array<i32>} : memref<36x288xf32, #tpu.memory_space<vmem>>, vector<12x288xf32>,
    %3 = vector.extract_strided_slice %1 {offsets = [0, 1], sizes = [12, 287], strides = [1, 1]} : vector<12x288xf32> to vector<12x287xf32>
    %c12 = arith.constant 12 : index
    %c0_4 = arith.constant 0 : index
    %4 = vector.load %arg6[%c12, %c0_4] : memref<36x288xf32, #tpu.memory_space<vmem>>, vector<12x287xf32>
    tpu.vector_store %arg6[%c12, %c0_4], %3 {strides = array<i32>} : memref<36x288xf32, #tpu.memory_space<vmem>>, vector<12x287xf32>,
    %cst = arith.constant 0.000000e+00 : f32
    %5 = vector.broadcast %cst : f32 to vector<12x1xf32>
    %c12_5 = arith.constant 12 : index
    %c287 = arith.constant 287 : index
    %6 = vector.load %arg6[%c12_5, %c287] : memref<36x288xf32, #tpu.memory_space<vmem>>, vector<12x1xf32>
    tpu.vector_store %arg6[%c12_5, %c287], %5 {strides = array<i32>} : memref<36x288xf32, #tpu.memory_space<vmem>>, vector<12x1xf32>,
    %7 = vector.extract_strided_slice %1 {offsets = [0, 2], sizes = [12, 286], strides = [1, 1]} : vector<12x288xf32> to vector<12x286xf32>
    %c24 = arith.constant 24 : index
    %c0_6 = arith.constant 0 : index
    %8 = vector.load %arg6[%c24, %c0_6] : memref<36x288xf32, #tpu.memory_space<vmem>>, vector<12x286xf32>
    tpu.vector_store %arg6[%c24, %c0_6], %7 {strides = array<i32>} : memref<36x288xf32, #tpu.memory_space<vmem>>, vector<12x286xf32>,
    %cst_7 = arith.constant 0.000000e+00 : f32
    %9 = vector.broadcast %cst_7 : f32 to vector<12x2xf32>
    %c24_8 = arith.constant 24 : index
    %c286 = arith.constant 286 : index
    %10 = vector.load %arg6[%c24_8, %c286] : memref<36x288xf32, #tpu.memory_space<vmem>>, vector<12x2xf32>
    tpu.vector_store %arg6[%c24_8, %c286], %9 {strides = array<i32>} : memref<36x288xf32, #tpu.memory_space<vmem>>, vector<12x2xf32>,
    %c0_9 = arith.constant 0 : index
    %c0_10 = arith.constant 0 : index
    %11 = vector.load %arg3[%c0_9, %c0_10] : memref<16x36xf32, #tpu.memory_space<vmem>>, vector<16x36xf32>
    %c0_11 = arith.constant 0 : index
    %c0_12 = arith.constant 0 : index
    %12 = vector.load %arg6[%c0_11, %c0_12] : memref<36x288xf32, #tpu.memory_space<vmem>>, vector<36x288xf32>
    %cst_13 = arith.constant dense<0.000000e+00> : vector<16x288xf32>
    %13 = tpu.matmul %11, %12, %cst_13 {dimension_numbers = #tpu.dot_dimension_numbers<[1], [0], [0], [1], [0, 0, 1, 1], [], []>} : vector<16x36xf32>, vector<36x288xf32>, vector<16x288xf32> -> vector<16x288xf32>
    %c0_14 = arith.constant 0 : index
    %c0_15 = arith.constant 0 : index
    %14 = vector.load %arg4[%c0_14, %c0_15] : memref<16x1xf32, #tpu.memory_space<vmem>>, vector<16x1xf32>
    %15 = vector.broadcast %14 : vector<16x1xf32> to vector<16x288xf32>
    %16 = arith.addf %13, %15 : vector<16x288xf32>
    %cst_16 = arith.constant 0.000000e+00 : f32
    %17 = vector.broadcast %cst_16 : f32 to vector<16x288xf32>
    %18 = arith.cmpf oge, %16, %17 : vector<16x288xf32>
    %cst_17 = arith.constant 1.000000e-01 : f32
    %19 = vector.broadcast %cst_17 : f32 to vector<16x288xf32>
    %20 = arith.mulf %19, %16 : vector<16x288xf32>
    %21 = arith.select %18, %16, %20 : vector<16x288xi1>, vector<16x288xf32>
    %c0_18 = arith.constant 0 : index
    %c0_19 = arith.constant 0 : index
    %c0_20 = arith.constant 0 : index
    %22 = vector.load %arg5[%c0_18, %c0_19, %c0_20] : memref<1x16x288xf32, #tpu.memory_space<vmem>>, vector<1x16x288xf32>
    %23 = vector.shape_cast %22 : vector<1x16x288xf32> to vector<16x288xf32>
    %24 = vector.shape_cast %21 : vector<16x288xf32> to vector<1x16x288xf32>
    tpu.vector_store %arg5[%c0_18, %c0_19, %c0_20], %24 {strides = array<i32>} : memref<1x16x288xf32, #tpu.memory_space<vmem>>, vector<1x16x288xf32>,
    return
  }
  func.func @transform_0(%arg0: i32, %arg1: i32) -> (i32, i32, i32) {
    %c0_i32 = arith.constant 0 : i32
    %c0_i32_0 = arith.constant 0 : i32
    return %arg0, %c0_i32, %arg1 : i32, i32, i32
  }
  func.func @transform_1(%arg0: i32, %arg1: i32) -> (i32, i32) {
    %c0_i32 = arith.constant 0 : i32
    %c0_i32_0 = arith.constant 0 : i32
    %c0_i32_1 = arith.constant 0 : i32
    return %c0_i32, %c0_i32_0 : i32, i32
  }
  func.func @transform_2(%arg0: i32, %arg1: i32) -> (i32, i32) {
    %c0_i32 = arith.constant 0 : i32
    %c0_i32_0 = arith.constant 0 : i32
    %c0_i32_1 = arith.constant 0 : i32
    return %c0_i32, %c0_i32_0 : i32, i32
  }
  func.func @transform_3(%arg0: i32, %arg1: i32) -> (i32, i32, i32) {
    %c0_i32 = arith.constant 0 : i32
    %c0_i32_0 = arith.constant 0 : i32
    return %arg0, %c0_i32, %arg1 : i32, i32, i32
  }
}

</mosaic_0001>

<bundles_post_ra>
// kernel: tpu_custom_call.1
= control target key start
LH: loop header
LB: loop body
LE: loop exit
PB: predicated region body
PF: predicated region fallthrough
CT: control target
= control target key end

     0   :  { %8 = vsyncpa [#allocation4], 0  ;;  %s891_s0 = inlined_call_operand.vmem [shape: f32[2,12,288], index: 0, kind: input, shape index: {}]   ;;  %s892_s1 = inlined_call_operand.vmem [shape: f32[16,36], index: 1, kind: input, shape index: {}]   ;;  %s893_s2 = inlined_call_operand.vmem [shape: f32[16,1], index: 2, kind: input, shape index: {}]   ;;  %s894_s3 = inlined_call_operand.hbm [shape: f32[2,16,288], index: 3, kind: output, shape index: {}]  }
   0x1   :  { %10 = vsyncpa [#allocation4 + $0x1], 0  ;;  %s730_s12 = smov 0   ;;  %s732_s13 = smov 0  }
   0x2   :  { %s734_s14 = smov 0   ;;  %s736_s15 = smov 0  }
   0x3   :  { %s738_s16 = smov 0   ;;  %s740_s17 = smov 0  }
   0x4 LB: > { %s535_s18 = sadd.s32 4294967295, %s702_s17   ;;  %s536_s19 = sadd.s32 4294967294, %s702_s17   ;;  %s702_s17 = sphi %s740_s17, %s16_s17   ;;  %s698_s16 = sphi %s738_s16, %s901_s16   ;;  %s694_s15 = sphi %s736_s15, %s900_s15   ;;  %s690_s14 = sphi %s734_s14, %s899_s14   ;;  %s686_s13 = sphi %s732_s13, %s898_s13   ;;  %s682_s12 = sphi %s730_s12, %s897_s12  }
   0x5   : > { %s28_s20 = sadd.s32 1, %s698_s16  ;;  %s107_s21 = sadd.s32 1, %s690_s14 }
   0x6   : > { %p30_p0 = scmp.ge.s32.totalorder %s28_s20, 2  ;;  %p117_p1 = scmp.ne.s32.totalorder %s690_s14, %s686_s13 }
   0x7   : > { %p118_p2 = scmp.eq.s32.totalorder %s535_s18, 1  ;;  %p123_p3 = scmp.ne.s32.totalorder %s686_s13, %s682_s12 }
   0x8   : > { %s903_s20 = smov (%p30_p0, %s28_s20), 0  ;;  %p124_p5 = scmp.eq.s32.totalorder %s536_s19, 1 }
   0x9   : > { %p770_p4 = por %p118_p2, %p117_p1  ;;  %s102_s23 = ssub.s32 %s698_s16, %s903_s20 }
   0xa   : > { %p539_p6 = scmp.ge.s32.totalorder %s702_s17, 1  ;;  %p105_p7 = scmp.eq.s32.totalorder %s102_s23, 0 }
   0xb   : > { %p777_p8 = por %p124_p5, %p123_p3  ;;  %p161_p9 = scmp.lt.s32.totalorder %s702_s17, 3 }
   0xc   : > { %s783_s25 = scalar_select %p105_p7, %s690_s14, %s107_s21  }
   0xd   : > { %p162_p10 = pnand %p539_p6, %p161_p9 }
   0xe   : > { %p190_p11 = scmp.lt.s32.totalorder (!%p162_p10), %s694_s15, 1  ;;  %s704_s4 = smov (!%p162_p10), 126  }
   0xf   : > { %165 = sbr.rel (%p162_p10) target bundleno = 320 (0x140), region = 32  ;;  %s705_s5 = smov (!%p162_p10), 127  }
  0x10   : > { %s186_s21 = sand.u32 (!%p162_p10), 1, %s686_s13   ;;  %s644_s10 = scalar_lea.hbm (!%p162_p10), %s894_s3, 96 }
  0x11   : > { %s558_s23 = smul.u32 (!%p162_p10), 48, %s186_s21 }
  0x14   : > { %s191_s26 = scalar_select %p190_p11, %s694_s15, 1  ;;  %vm212_vm0 = vcmask 257024   ;;  %vm208_vm1 = vcmask 261120   ;;  %vm220_vm2 = vcmask 1043456   ;;  %vm277_vm3 = vcmask 1031168   ;;  %v317_v28 = vld [vmem:[%s893_s2] sm:$0xff] }
  0x15   : > { %vm294_vm4 = vcmask 240640   ;;  %vm298_vm5 = vcmask 257264   ;;  %vm255_vm6 = vcmask 252932   ;;  %vm261_vm7 = vcmask 261372   ;;  %v318_v29 = vld [vmem:[%s893_s2 + $0x8] sm:$0xff]  ;;  %v300_v41 = vld [vmem:[%s892_s1] sm:$0xff] }
  0x16   : > { %s559_s27 = smul.u32 48, %s191_s26  ;;  %v706_v22 = vmov 0.0   ;;  %vm290_vm8 = vcmask 244736   ;;  %vm296_vm9 = vcmask 261360   ;;  %vm259_vm10 = vcmask 252928   ;;  %v301_v48 = vld [vmem:[%s892_s1 + $0x8] sm:$0xff] }
  0x17   : > { %vm263_vm11 = vcmask 261368   ;;  %v707_v30 = vmov 0   ;;  %vm242_vm12 = vcmask 1039360   ;;  %vm329_vm13 = vcmask 293888   ;;  %s560_s26 = smul.u32 48, %s694_s15 }
  0x18   : > { %s197_s30 = scalar_lea.vmem %s891_s0, %s559_s27  ;;  %622 = vset.pattern.permute.xlu0 %v707_v30  ;;  %623 = vset.pattern.permute.xlu1 %v707_v30  ;;  %s843_s27 = scalar_lea.vmem [#allocation3], %s558_s23 }
  0x19   : > { %v205_v0 = vld [vmem:[%s197_s30 + $0x28] sm:$0xf]  ;;  %v202_v1 = vld [vmem:[%s197_s30 + $0x10] sm:$0xff]  ;;  %v203_v3 = vld [vmem:[%s197_s30 + $0x18] sm:$0xf]  ;;  %s452_s15 = scalar_lea.hbm %s894_s3, %s560_s26 }
  0x1a   : > { %275 = vrot.lane.b32.xlu0 %v205_v0, %s704_s4  ;;  %213 = vst.msk [vmem:[#allocation2 + $0x28] sm:$0xf] %vm212_vm0, %v205_v0  ;;  %v223_v2 = vrot.slane %v202_v1, 4  ;;  %v204_v4 = vld [vmem:[%s197_s30 + $0x20] sm:$0xf]  ;;  %v228_v5 = vrot.slane %v205_v0, 4 }
  0x1b   : > { %209 = vst.msk [vmem:[#allocation2 + $0x10] sm:$0xff] %vm208_vm1, %v202_v1  ;;  %273 = vrot.lane.b32.xlu2 %v204_v4, %s704_s4  ;;  %v791_v6 = vld [vmem:[%s197_s30 + $0x8] sm:$0xff]  ;;  %v793_v7 = vld [vmem:[%s197_s30] sm:$0xff]  ;;  %v226_v10 = vrot.slane %v204_v4, 4  ;;  %v224_v12 = vrot.slane %v203_v3, 4  ;;  %s453_s30 = sshll.u32 %s843_s27, 4  ;;  %s454_s30 = int_to_ptr.vmem [resolvable:$true] %s453_s30 }
  0x1c   : > { %234 = vrot.lane.b32.xlu1 %v223_v2, %s705_s5  ;;  %210 = vst [vmem:[#allocation2 + $0x18] sm:$0xf] %v203_v3  ;;  %v229_v8 = vsel %vm220_vm2, %v223_v2, %v228_v5  ;;  %v222_v9 = vrot.slane %v791_v6, 4  ;;  %v221_v13 = vrot.slane %v793_v7, 4 }
  0x1d   : > { %211 = vst [vmem:[#allocation2 + $0x20] sm:$0xf] %v204_v4 }
  0x1e   : > { %v227_v11 = vsel %vm220_vm2, %v222_v9, %v226_v10  ;;  %v225_v14 = vsel %vm220_vm2, %v221_v13, %v224_v12 }
  0x22   : > { %269 = vrot.lane.b32.xlu0 %v202_v1, %s704_s4  ;;  %v304_v39 = vld [vmem:[#allocation2 + $0x10] sm:$0xff] }
  0x23   : > { %267 = vrot.lane.b32.xlu2 %v791_v6, %s704_s4 }
  0x24   : > { %240 = vrot.lane.b32.xlu1 %v229_v8, %s705_s5 }
  0x2a   : > { %271 = vrot.lane.b32.xlu0 %v203_v3, %s704_s4 }
  0x2b   : > { %265 = vrot.lane.b32.xlu2 %v793_v7, %s704_s4  ;;  %s455_s4 = sshll.u32 %s452_s15, 4  ;;  %s456_s4 = int_to_ptr.hbm [resolvable:$true] %s455_s4 }
  0x2c   : > { %238 = vrot.lane.b32.xlu1 %v227_v11, %s705_s5  ;;  %s638_s6 = sshra.s32 %s456_s4, 4  ;;  %s639_s6 = int_to_ptr.hbm [resolvable:$true] %s638_s6 }
  0x2d   : > { %s640_s7 = scalar_lea.hbm %s639_s6, 48  ;;  %p645_p1 = scmp.lt.s32.totalorder %s639_s6, %s894_s3 }
  0x2e   : > { %p641_p12 = scmp.ne.s32.totalorder %s639_s6, %s640_s7  ;;  %p646_p2 = scmp.lt.s32.totalorder %s644_s10, %s640_s7 }
  0x30   : > { %p642_p13 = pnand %p641_p12, %p770_p4  ;;  %p647_p3 = por %p646_p2, %p645_p1 }
  0x32   : > { %232 = vrot.lane.b32.xlu0 %v222_v9, %s705_s5  ;;  %p643_p0 = pneg %p642_p13 }
  0x33   : > { %230 = vrot.lane.b32.xlu2 %v221_v13, %s705_s5 }
  0x34   : > { %236 = vrot.lane.b32.xlu1 %v225_v14, %s705_s5  ;;  %s439_s5 = scalar_lea.sflag [#allocation4], %s186_s21  ;;  %p648_p5 = pnand %p647_p3, %p643_p0 }
  0x3a   : > { %321 = vperm.xlu0 %622, %v317_v28  }
  0x3c   : > { %326 = vperm.xlu1 %623, %v318_v29  }
  0x75   : > { %v274_v15 = vpop.permute.xlu2 %273 }
  0x7d   : > { %v268_v16 = vpop.permute.xlu2 %267 }
  0x85   : > { %v266_v17 = vpop.permute.xlu2 %265 }
  0x86   : > { %v803_v18 = vsel %vm277_vm3, %v266_v17, %v268_v16 }
  0x8c   : > { %v276_v19 = vpop.permute.xlu0 %275 }
  0x8d   : > { %v281_v20 = vsel %vm277_vm3, %v274_v15, %v276_v19  ;;  %295 = vst.msk [vmem:[#allocation2 + $0x70] sm:$0xf] %vm294_vm4, %v276_v19  ;;  %v231_v38 = vpop.permute.xlu2 %230 }
  0x8e   : > { %293 = vst [vmem:[#allocation2 + $0x68] sm:$0xf] %v281_v20  ;;  %v235_v21 = vpop.permute.xlu1 %234 }
  0x8f   : > { %299 = vst.msk [vmem:[#allocation2 + $0x70] sm:$0xf] %vm298_vm5, %v706_v22 }
  0x90   : > { %256 = vst.msk [vmem:[#allocation2 + $0x28] sm:$0xf0] %vm255_vm6, %v235_v21 }
  0x91   : > { %262 = vst.msk [vmem:[#allocation2 + $0x28] sm:$0xf0] %vm261_vm7, %v706_v22 }
  0x94   : > { %v270_v23 = vpop.permute.xlu0 %269 }
  0x95   : > { %v279_v24 = vsel %vm277_vm3, %v268_v16, %v270_v23  ;;  %291 = vst.msk [vmem:[#allocation2 + $0x58] sm:$0xff] %vm290_vm8, %v270_v23  ;;  %v315_v25 = vld [vmem:[#allocation2 + $0x68] sm:$0xf] }
  0x96   : > { %v241_v26 = vpop.permute.xlu1 %240  ;;  %544 = vmatpush.msk.msra.mxu1 %vm220_vm2, %v315_v25  ;;  %v316_v27 = vld [vmem:[#allocation2 + $0x70] sm:$0xf]  ;;  %297 = vst.msk [vmem:[#allocation2 + $0x58] sm:$0xff] %vm296_vm9, %v706_v22 }
  0x97   : > { %547 = vmatpush.msk.msra.mxu2 %vm220_vm2, %v316_v27  ;;  %260 = vst.msk [vmem:[#allocation2 + $0x40] sm:$0xff] %vm259_vm10, %v241_v26 }
  0x98   : > { %380 = vmatpush.msra.mxu1 %v279_v24  ;;  %264 = vst.msk [vmem:[#allocation2 + $0x40] sm:$0xff] %vm263_vm11, %v706_v22  ;;  %v307_v37 = vld [vmem:[#allocation2 + $0x28] sm:$0xff] }
  0x9c   : > { %v272_v31 = vpop.permute.xlu0 %271 }
  0x9d   : > { %v280_v32 = vsel %vm277_vm3, %v272_v31, %v274_v15  ;;  %v313_v34 = vld [vmem:[#allocation2 + $0x58] sm:$0xff] }
  0x9e   : > { %292 = vst [vmem:[#allocation2 + $0x60] sm:$0xf] %v280_v32  ;;  %v239_v33 = vpop.permute.xlu1 %238  ;;  %403 = vmatpush.msra.mxu2 %v313_v34 }
  0x9f   : > { %v246_v35 = vsel %vm242_vm12, %v239_v33, %v241_v26  ;;  %v310_v36 = vld [vmem:[#allocation2 + $0x40] sm:$0xff] }
  0xa0   : > { %381 = vmatpush.msra.mxu1 %v246_v35  ;;  %404 = vmatpush.msra.mxu2 %v310_v36 }
  0xa2   : > { %405 = vmatpush.msra.mxu2 %v307_v37 }
  0xa4   : > { %v233_v40 = vpop.permute.xlu0 %232  ;;  %406 = vmatpush.msra.mxu2 %v304_v39 }
  0xa5   : > { %v244_v42 = vsel %vm242_vm12, %v233_v40, %v235_v21  ;;  %v314_v43 = vld [vmem:[#allocation2 + $0x60] sm:$0xf]  ;;  %v243_v44 = vsel %vm242_vm12, %v231_v38, %v233_v40  ;;  %548 = vmatmul.msk.f32.vlgmr.msra.gmra.mxu2 %vm329_vm13, %v300_v41 }
  0xa6   : > { %254 = vst [vmem:[#allocation2 + $0x20] sm:$0xf0] %v244_v42  ;;  %541 = vmatpush.msk.msra.mxu0 %vm220_vm2, %v314_v43  ;;  %553 = vmatpush.msk.msra.mxu3 %vm220_vm2, %v314_v43  ;;  %v237_v45 = vpop.permute.xlu1 %236 }
  0xa7   : > { %253 = vst [vmem:[#allocation2 + $0x18] sm:$0xf0] %v243_v44  ;;  %v245_v46 = vsel %vm242_vm12, %v237_v45, %v239_v33 }
  0xa8   : > { %357 = vmatpush.msra.mxu0 %v803_v18  ;;  %554 = vmatpush.msra.mxu3 %v803_v18 }
  0xaa   : > { %358 = vmatpush.msra.mxu0 %v245_v46  ;;  %555 = vmatpush.msra.mxu3 %v245_v46 }
  0xac   : > { %v322_v50 = vpop.permute.xlu0 %321 }
  0xad   : > { %v306_v47 = vld [vmem:[#allocation2 + $0x20] sm:$0xff]  ;;  %549 = vmatmul.msk.f32.gmra.mxu2 %vm329_vm13, %v301_v48 }
  0xae   : > { %382 = vmatpush.msra.mxu1 %v306_v47  ;;  %v305_v49 = vld [vmem:[#allocation2 + $0x18] sm:$0xff]  ;;  %v327_v59 = vpop.permute.xlu1 %326 }
  0xaf   : > { %359 = vmatpush.msra.mxu0 %v305_v49  ;;  %556 = vmatpush.msra.mxu3 %v305_v49 }
  0xb0   : > { %383 = vmatpush.msra.mxu1 %v791_v6 }
  0xb1   : > { %545 = vmatmul.msk.f32.vlgmr.msra.gmra.mxu1 %vm329_vm13, %v300_v41  ;;  %557 = vmatpush.msra.mxu3 %v793_v7 }
  0xb2   : > { %543 = vmatmul.msk.f32.vlgmr.msra.gmra.mxu3 %vm329_vm13, %v301_v48  ;;  %360 = vmatpush.msra.mxu0 %v793_v7 }
  0xb3   : > { %542 = vmatmul.msk.f32.vlgmr.msra.gmra.mxu0 %vm329_vm13, %v300_v41 }
  0xb9   : > { %546 = vmatmul.msk.f32.gmra.mxu1 %vm329_vm13, %v301_v48 }
 0x128   : > { %v408_v51 = vpop.f32.mrf.mxu2 }
 0x129   : > { %v409_v52 = vadd.f32 %v408_v51, %v322_v50 }
 0x12b   : > { %vm416_vm14 = vcmp.ge.f32.partialorder %v409_v52, 0.0  ;;  %v422_v53 = vmul.f32 0.1, %v409_v52 }
 0x12d   : > { %v428_v55 = vsel %vm416_vm14, %v409_v52, %v422_v53 }
 0x12e   : > { %v385_v54 = vpop.f32.mrf.mxu1  ;;  %434 = vst.msk [vmem:[%s843_s27 + $0x10] sm:$0xff] %vm208_vm1, %v428_v55 }
 0x12f   : > { %v386_v56 = vadd.f32 %v385_v54, %v322_v50 }
 0x130   : > { %v362_v57 = vpop.f32.mrf.mxu0  ;;  %v411_v62 = vpop.f32.mrf.mxu2 }
 0x131   : > { %vm415_vm15 = vcmp.ge.f32.partialorder %v386_v56, 0.0  ;;  %v421_v58 = vmul.f32 0.1, %v386_v56  ;;  %v363_v60 = vadd.f32 %v362_v57, %v322_v50  ;;  %v412_v0 = vadd.f32 %v411_v62, %v327_v59 }
 0x133   : > { %v427_v61 = vsel %vm415_vm15, %v386_v56, %v421_v58  ;;  %vm414_vm0 = vcmp.ge.f32.partialorder %v363_v60, 0.0  ;;  %v420_v63 = vmul.f32 0.1, %v363_v60  ;;  %vm419_vm2 = vcmp.ge.f32.partialorder %v412_v0, 0.0 }
 0x134   : > { %433 = vst [vmem:[%s843_s27 + $0x8] sm:$0xff] %v427_v61  ;;  %v425_v4 = vmul.f32 0.1, %v412_v0 }
 0x135   : > { %v426_v1 = vsel %vm414_vm0, %v363_v60, %v420_v63  ;;  %v365_v2 = vpop.f32.mrf.mxu3 }
 0x136   : > { %v388_v3 = vpop.f32.mrf.mxu1  ;;  %432 = vst [vmem:[%s843_s27] sm:$0xff] %v426_v1  ;;  %v366_v5 = vadd.f32 %v365_v2, %v327_v59  ;;  %v431_v7 = vsel %vm419_vm2, %v412_v0, %v425_v4 }
 0x137   : > { %v389_v6 = vadd.f32 %v388_v3, %v327_v59  ;;  %437 = vst.msk [vmem:[%s843_s27 + $0x28] sm:$0xff] %vm208_vm1, %v431_v7 }
 0x138   : > { %vm417_vm3 = vcmp.ge.f32.partialorder %v366_v5, 0.0  ;;  %v423_v8 = vmul.f32 0.1, %v366_v5 }
 0x139   : > { %vm418_vm4 = vcmp.ge.f32.partialorder %v389_v6, 0.0  ;;  %v424_v9 = vmul.f32 0.1, %v389_v6 }
 0x13a   : > { %v429_v10 = vsel %vm417_vm3, %v366_v5, %v423_v8 }
 0x13b   : > { %v430_v11 = vsel %vm418_vm4, %v389_v6, %v424_v9  ;;  %435 = vst [vmem:[%s843_s27 + $0x18] sm:$0xff] %v429_v10 }
 0x13c   : > { %436 = vst [vmem:[%s843_s27 + $0x20] sm:$0xff] %v430_v11 }
 0x13d   : > { %651 = shalt.err (!%p648_p5)
}
 0x13e   : > { %s708_s19 = smov 384   ;;  %s709_s21 = smov 24  }
 0x13f   : > { %561 = dma.vmem_to_hbm [thread:$0]  (%p770_p4), %s454_s30, 768, %s456_s4, %s439_s5, %s708_s19, %s708_s19, %s709_s21  }
 0x140 PF: > { %p567_p6 = scmp.ge.s32.totalorder %s702_s17, 2  ;;  %s470_s23 = sand.u32 1, %s682_s12  }
 0x141   : > { %s471_s26 = scalar_lea.sflag [#allocation4], %s470_s23 }
 0x142   : > { %p564_p7 = pnand %p567_p6, %p777_p8 }
 0x144   : > { %p565_p9 = pneg %p564_p7 }
 0x146   : > { %677 = dma.done.wait (%p565_p9), %s471_s26, 768  }
 0x147   : > { %679 = vsyncadd (%p565_p9), %s471_s26, 4294966528  ;;  %s16_s17 = sadd.s32 1, %s702_s17   ;;  %s897_s12 = smov %s686_s13 }
 0x148   : > { %p13_p10 = scmp.ge.s32.totalorder %s16_s17, 4   ;;  %s898_s13 = smov %s690_s14 }
 0x149   : > { %s899_s14 = smov %s783_s25  ;;  %s900_s15 = smov %s698_s16 }
 0x14a   : > { %s901_s16 = smov %s903_s20  ;;  %15 = sbr.rel (!%p13_p10) target bundleno = 4 (0x4), region = 67 }
 0x14f   :  { %477 = vsyncpa [#allocation4], 1 }
 0x150   :  { %479 = vsyncpa [#allocation4 + $0x1], 1 }

</bundles_post_ra>
